<compile_context>
chip_gen: v6e
topology: v6e:2x2x1
jax: 0.10.0
libtpu: 0.0.40
codegen_flags: <defaults>
</compile_context>

<pallas_src>
import jax
import jax.numpy as jnp
from jax.experimental import pallas as pl
from jax.experimental.pallas import tpu as pltpu


def _round_up(a, b):
    return (a + b - 1) // b * b


def _largest_divisor_tile(dim, candidates=(512, 256, 128)):
    for c in candidates:
        if c <= dim and dim % c == 0:
            return c
    return dim


# ---------------------------------------------------------------------------
# Kernels
# ---------------------------------------------------------------------------
def _patch_embed_kernel_resident(x_ref, w_ref, b_ref, o_ref):
    # x:(tm,K)  w:(K,E_pad) resident  b:(1,E_pad) f32 resident  o:(tm,E_pad)
    o_ref[...] = (jnp.dot(x_ref[...], w_ref[...],
                          preferred_element_type=jnp.float32)
                  + b_ref[...]).astype(o_ref.dtype)


def _patch_embed_kernel_ktiled(x_ref, w_ref, b_ref, o_ref, acc_ref):
    # x:(tm,tk)  w:(tk,E_pad)  b:(1,E_pad) f32  o:(tm,E_pad)  acc:(tm,E_pad) f32
    k = pl.program_id(1)

    @pl.when(k == 0)
    def _():
        acc_ref[...] = jnp.zeros_like(acc_ref)

    acc_ref[...] += jnp.dot(x_ref[...], w_ref[...],
                            preferred_element_type=jnp.float32)

    @pl.when(k == pl.num_programs(1) - 1)
    def _():
        o_ref[...] = (acc_ref[...] + b_ref[...]).astype(o_ref.dtype)


# ---------------------------------------------------------------------------
# Wrapper
# ---------------------------------------------------------------------------
def patch_embedding_block(x, weight, bias, patch_size, *,
                          compute_dtype=None,
                          max_resident_weight_bytes=16 * 1024 * 1024):
    """x: (N, C, D, H, W); weight: (E, C, P, P, P); bias: (E,). Returns (N, Np, E).

    compute_dtype: optional operand dtype for the matmul (bf16 recommended on
    v6e/v7x). Accumulation is always f32; output keeps x.dtype.
    """
    N, C, D, H, W = x.shape
    E = weight.shape[0]
    P = patch_size
    Dp, Hp, Wp = D // P, H // P, W // P
    Np = Dp * Hp * Wp
    K = C * P * P * P
    M = N * Np

    out_dtype = x.dtype
    cdtype = jnp.dtype(compute_dtype) if compute_dtype is not None else jnp.dtype(x.dtype)
    isz = jnp.dtype(cdtype).itemsize
    osz = jnp.dtype(out_dtype).itemsize

    # Cast to compute width BEFORE the patch-extract transpose so any staged
    # HBM copy of the (M, K) activation is already narrow.
    xc = x.astype(cdtype)
    wc = weight.astype(cdtype)

    # Patch matrix X_p (M, K), columns flattened in (c, kd, kh, kw) order to
    # match the Conv3d weight layout (E, C, P, P, P).
    xp = xc.reshape(N, C, Dp, P, Hp, P, Wp, P)
    xp = xp.transpose(0, 2, 4, 6, 1, 3, 5, 7).reshape(M, K)   # (M, K)
    wk = wc.reshape(E, K).T                                   # (K, E)

    # Lane-dense output: pad E to a 128 multiple (unmasked vst).
    # M padded only to a 128 multiple (minimal garbage rows).
    # K stays UNPADDED on the resident path.
    E_pad = _round_up(E, 128)
    M_pad = _round_up(M, 128)

    wk = jnp.pad(wk, ((0, 0), (0, E_pad - E)))
    bk = jnp.pad(bias.astype(jnp.float32), (0, E_pad - E)).reshape(1, E_pad)
    xp = jnp.pad(xp, ((0, M_pad - M), (0, 0)))

    vmem_budget = 24 * 1024 * 1024  # working-set target (fits all generations)

    def _pick_tm(fixed_bytes, per_row_bytes):
        # Largest tile dividing M_pad under budget; keep >=2 M steps when
        # possible so v7x can shard the parallel axis across its 2 TCs.
        cap = M_pad if M_pad < 256 else max(128, M_pad // 2)
        for c in (1024, 512, 256, 128):
            if c <= cap and M_pad % c == 0 and fixed_bytes + c * per_row_bytes <= vmem_budget:
                return c
        return 128

    resident = 2 * K * E_pad * isz <= max_resident_weight_bytes

    if resident:
        # ---- Path A: weight + bias resident in VMEM, 1-D grid over M. ----
        fixed = 2 * K * E_pad * isz + 2 * E_pad * 4            # weight + bias (dbl-buf)
        per_row = 2 * K * isz + 2 * E_pad * osz                # x row + out row (dbl-buf)
        tm = _pick_tm(fixed, per_row)
        vmem_need = fixed + tm * per_row
        vmem_limit = int(min(max(2 * vmem_need, 8 * 1024 * 1024), 64 * 1024 * 1024))

        out = pl.pallas_call(
            _patch_embed_kernel_resident,
            out_shape=jax.ShapeDtypeStruct((M_pad, E_pad), out_dtype),
            grid_spec=pltpu.PrefetchScalarGridSpec(
                num_scalar_prefetch=0,
                grid=(M_pad // tm,),
                in_specs=[
                    pl.BlockSpec((tm, K), lambda i: (i, 0)),      # X_p rows (read once)
                    pl.BlockSpec((K, E_pad), lambda i: (0, 0)),   # weight, resident
                    pl.BlockSpec((1, E_pad), lambda i: (0, 0)),   # bias, resident
                ],
                out_specs=pl.BlockSpec((tm, E_pad), lambda i: (i, 0)),
            ),
            compiler_params=pltpu.CompilerParams(
                dimension_semantics=("parallel",),
                vmem_limit_bytes=vmem_limit,
                allow_input_fusion=[True, False, False],
            ),
        )(xp, wk, bk)
    else:
        # ---- Path B: K too large for a resident weight; tile K with an f32
        # accumulator.  tn is still E_pad so X_p is read from HBM once. ----
        K_pad = _round_up(K, 128)
        xp = jnp.pad(xp, ((0, 0), (0, K_pad - K)))
        wk = jnp.pad(wk, ((0, K_pad - K), (0, 0)))
        tk = _largest_divisor_tile(K_pad, (512, 256, 128))
        fixed = 2 * tk * E_pad * isz + 2 * E_pad * 4
        per_row = 2 * tk * isz + 2 * E_pad * osz + E_pad * 4   # x + out (dbl-buf) + acc
        tm = _pick_tm(fixed, per_row)
        vmem_need = fixed + tm * per_row
        vmem_limit = int(min(max(2 * vmem_need, 8 * 1024 * 1024), 64 * 1024 * 1024))

        out = pl.pallas_call(
            _patch_embed_kernel_ktiled,
            out_shape=jax.ShapeDtypeStruct((M_pad, E_pad), out_dtype),
            grid_spec=pltpu.PrefetchScalarGridSpec(
                num_scalar_prefetch=0,
                grid=(M_pad // tm, K_pad // tk),
                in_specs=[
                    pl.BlockSpec((tm, tk), lambda i, k: (i, k)),
                    pl.BlockSpec((tk, E_pad), lambda i, k: (k, 0)),
                    pl.BlockSpec((1, E_pad), lambda i, k: (0, 0)),
                ],
                out_specs=pl.BlockSpec((tm, E_pad), lambda i, k: (i, 0)),
                scratch_shapes=[pltpu.VMEM((tm, E_pad), jnp.float32)],
            ),
            compiler_params=pltpu.CompilerParams(
                dimension_semantics=("parallel", "arbitrary"),
                vmem_limit_bytes=vmem_limit,
                allow_input_fusion=[True, False, False],
            ),
        )(xp, wk, bk)

    out = out[:M, :E].reshape(N, Np, E)
    # Dropout(rate=0.0) is the identity.
    # TODO(synk): non-zero dropout would need pltpu.prng_random_bits in-kernel;
    # the module default is 0.0.
    return out


def reference(x, weight, bias, patch_size):
    """Pure-JAX reference: Conv3d(stride=kernel) + flatten + transpose."""
    y = jax.lax.conv_general_dilated(
        x, weight,
        window_strides=(patch_size,) * 3,
        padding="VALID",
        dimension_numbers=("NCDHW", "OIDHW", "NCDHW"),
    )
    y = y + bias.reshape(1, -1, 1, 1, 1)
    N, E = y.shape[0], y.shape[1]
    y = y.reshape(N, E, -1)          # Flatten(start_dim=2)
    return jnp.swapaxes(y, -1, -2)   # transpose(-1, -2)


if __name__ == "__main__":
    # Small shapes consistent with the module (spatial_dims=3):
    N, C, P, E = 2, 4, 2, 32
    D = H = W = 8                    # -> Np = 4*4*4 = 64, M = 128, K = 32

    key = jax.random.PRNGKey(0)
    kx, kw, kb = jax.random.split(key, 3)
    x = jax.random.normal(kx, (N, C, D, H, W), dtype=jnp.float32)
    weight = 0.02 * jax.random.truncated_normal(
        kw, -2.0, 2.0, (E, C, P, P, P), dtype=jnp.float32)
    bias = 0.01 * jax.random.normal(kb, (E,), dtype=jnp.float32)

    ref = reference(x, weight, bias, P)

    # Path A (weight resident, 1-D grid), f32 compute.
    out = jax.block_until_ready(patch_embedding_block(x, weight, bias, P))
    assert out.shape == (N, (D // P) * (H // P) * (W // P), E)
    assert jnp.allclose(out, ref, atol=1e-5, rtol=1e-5)

    # Path B (K-tiled accumulator fallback), forced, f32 compute.
    out_kt = jax.block_until_ready(
        patch_embedding_block(x, weight, bias, P, max_resident_weight_bytes=0))
    assert jnp.allclose(out_kt, ref, atol=1e-5, rtol=1e-5)

    # bf16 compute path (MXU-native on v6e/v7x); f32 accumulation in-kernel.
    # Accepted accuracy contract: bf16 operands vs f32 conv reference ~2e-2.
    out_bf16 = jax.block_until_ready(
        patch_embedding_block(x, weight, bias, P, compute_dtype=jnp.bfloat16))
    assert out_bf16.shape == out.shape
    assert jnp.allclose(out_bf16, ref, atol=2e-2, rtol=2e-2)

    print("KERNEL_OK")
</pallas_src>

<mosaic_0001>
module attributes {stable_mosaic.version = 11 : i64} {
  func.func @_patch_embed_kernel_resident(%arg0: i32, %arg1: memref<128x32xf32, #tpu.memory_space<vmem>>, %arg2: memref<32x128xf32, #tpu.memory_space<vmem>>, %arg3: memref<1x128xf32, #tpu.memory_space<vmem>>, %arg4: memref<128x128xf32, #tpu.memory_space<vmem>>) attributes {dimension_semantics = [#tpu.dimension_semantics<parallel>], iteration_bounds = array<i64: 1>, scalar_prefetch = 0 : i64, scratch_operands = 0 : i64, tpu.core_type = #tpu.core_type<tc>, window_params = [{transform_indices = @transform_0, window_bounds = array<i64: 128, 32>}, {pipeline_mode = #tpu.pipeline_mode<synchronous>, transform_indices = @transform_1, window_bounds = array<i64: 32, 128>}, {pipeline_mode = #tpu.pipeline_mode<synchronous>, transform_indices = @transform_2, window_bounds = array<i64: 1, 128>}, {transform_indices = @transform_3, window_bounds = array<i64: 128, 128>}]} {
    %c0 = arith.constant 0 : index
    %c0_0 = arith.constant 0 : index
    %0 = vector.load %arg1[%c0, %c0_0] : memref<128x32xf32, #tpu.memory_space<vmem>>, vector<128x32xf32>
    %c0_1 = arith.constant 0 : index
    %c0_2 = arith.constant 0 : index
    %1 = vector.load %arg2[%c0_1, %c0_2] : memref<32x128xf32, #tpu.memory_space<vmem>>, vector<32x128xf32>
    %cst = arith.constant dense<0.000000e+00> : vector<128x128xf32>
    %2 = tpu.matmul %0, %1, %cst {dimension_numbers = #tpu.dot_dimension_numbers<[1], [0], [0], [1], [0, 0, 1, 1], [], []>} : vector<128x32xf32>, vector<32x128xf32>, vector<128x128xf32> -> vector<128x128xf32>
    %c0_3 = arith.constant 0 : index
    %c0_4 = arith.constant 0 : index
    %3 = vector.load %arg3[%c0_3, %c0_4] : memref<1x128xf32, #tpu.memory_space<vmem>>, vector<1x128xf32>
    %4 = vector.broadcast %3 : vector<1x128xf32> to vector<128x128xf32>
    %5 = arith.addf %2, %4 : vector<128x128xf32>
    %c0_5 = arith.constant 0 : index
    %c0_6 = arith.constant 0 : index
    %6 = vector.load %arg4[%c0_5, %c0_6] : memref<128x128xf32, #tpu.memory_space<vmem>>, vector<128x128xf32>
    tpu.vector_store %arg4[%c0_5, %c0_6], %5 {strides = array<i32>} : memref<128x128xf32, #tpu.memory_space<vmem>>, vector<128x128xf32>,
    return
  }
  func.func @transform_0(%arg0: i32) -> (i32, i32) {
    %c0_i32 = arith.constant 0 : i32
    %c0_i32_0 = arith.constant 0 : i32
    return %arg0, %c0_i32 : i32, i32
  }
  func.func @transform_1(%arg0: i32) -> (i32, i32) {
    %c0_i32 = arith.constant 0 : i32
    %c0_i32_0 = arith.constant 0 : i32
    %c0_i32_1 = arith.constant 0 : i32
    return %c0_i32, %c0_i32_0 : i32, i32
  }
  func.func @transform_2(%arg0: i32) -> (i32, i32) {
    %c0_i32 = arith.constant 0 : i32
    %c0_i32_0 = arith.constant 0 : i32
    %c0_i32_1 = arith.constant 0 : i32
    return %c0_i32, %c0_i32_0 : i32, i32
  }
  func.func @transform_3(%arg0: i32) -> (i32, i32) {
    %c0_i32 = arith.constant 0 : i32
    %c0_i32_0 = arith.constant 0 : i32
    return %arg0, %c0_i32 : i32, i32
  }
}

</mosaic_0001>

<bundles_post_ra>
// kernel: tpu_custom_call.1
= control target key start
LH: loop header
LB: loop body
LE: loop exit
PB: predicated region body
PF: predicated region fallthrough
CT: control target
= control target key end

     0   :  { %vm42_vm0 = vcmask 261120   ;;  %s475_s0 = inlined_call_operand.vmem [shape: f32[128,32], index: 0, kind: input, shape index: {}]   ;;  %s476_s1 = inlined_call_operand.vmem [shape: f32[32,128], index: 1, kind: input, shape index: {}]   ;;  %s477_s2 = inlined_call_operand.vmem [shape: f32[1,128], index: 2, kind: input, shape index: {}]   ;;  %s478_s3 = inlined_call_operand.hbm [shape: f32[128,128], index: 3, kind: output, shape index: {}]  }
   0x1   :  { %v34_v0 = vld [vmem:[%s476_s1 + $0x18] sm:$0xff]  ;;  %v33_v1 = vld [vmem:[%s476_s1 + $0x10] sm:$0xff]  ;;  %v32_v2 = vld [vmem:[%s476_s1 + $0x8] sm:$0xff] }
   0x2   :  { %305 = vmatprep.subr.mxu0 %v34_v0  ;;  %337 = vmatprep.subr.mxu1 %v34_v0  ;;  %v31_v3 = vld [vmem:[%s476_s1] sm:$0xff] }
   0x3   :  { %306 = vmatpush3.msra.mxu0 %v34_v0  ;;  %341 = vmatpush3.msra.mxu1 %v34_v0  ;;  %v15_v4 = vld [vmem:[%s475_s0] sm:$0xff] }
   0x4   :  { %307 = vmatprep.subr.mxu0 %v33_v1  ;;  %338 = vmatprep.subr.mxu1 %v33_v1  ;;  %v23_v5 = vld [vmem:[%s475_s0 + $0x40] sm:$0xff] }
   0x5   :  { %308 = vmatpush3.msra.mxu0 %v33_v1  ;;  %342 = vmatpush3.msra.mxu1 %v33_v1 }
   0x6   :  { %309 = vmatprep.subr.mxu0 %v32_v2  ;;  %339 = vmatprep.subr.mxu1 %v32_v2 }
   0x7   :  { %310 = vmatpush3.msra.mxu0 %v32_v2  ;;  %343 = vmatpush3.msra.mxu1 %v32_v2 }
   0x8   :  { %8 = vsyncpa [#allocation3], 0  ;;  %311 = vmatprep.subr.mxu0 %v31_v3  ;;  %340 = vmatprep.subr.mxu1 %v31_v3  ;;  %v16_v6 = vld [vmem:[%s475_s0 + $0x8] sm:$0xff]  ;;  %v17_v8 = vld [vmem:[%s475_s0 + $0x10] sm:$0xff] }
   0x9   :  { %v24_v7 = vld [vmem:[%s475_s0 + $0x48] sm:$0xff]  ;;  %312 = vmatpush3.msra.mxu0 %v31_v3  ;;  %344 = vmatpush3.msra.mxu1 %v31_v3  ;;  %v25_v9 = vld [vmem:[%s475_s0 + $0x50] sm:$0xff]  ;;  %v18_v10 = vld [vmem:[%s475_s0 + $0x18] sm:$0xff] }
   0xa   :  { %313 = vmatprep.mubr.msk.f32.mxu0 %vm42_vm0, %v15_v4  ;;  %325 = vmatprep.mubr.msk.f32.mxu1 %vm42_vm0, %v23_v5  ;;  %v26_v11 = vld [vmem:[%s475_s0 + $0x58] sm:$0xff]  ;;  %v19_v12 = vld [vmem:[%s475_s0 + $0x20] sm:$0xff]  ;;  %v20_v14 = vld [vmem:[%s475_s0 + $0x28] sm:$0xff] }
   0xb   :  { %314 = vmatmul.mubr.msk.f32.vlgmr.msra.gmra.mxu0 %vm42_vm0, %v16_v6  ;;  %326 = vmatmul.mubr.msk.f32.vlgmr.msra.gmra.mxu1 %vm42_vm0, %v24_v7  ;;  %v27_v13 = vld [vmem:[%s475_s0 + $0x60] sm:$0xff]  ;;  %v28_v15 = vld [vmem:[%s475_s0 + $0x68] sm:$0xff]  ;;  %v21_v16 = vld [vmem:[%s475_s0 + $0x30] sm:$0xff] }
   0xc   :  { %316 = vmatprep.mubr.msk.f32.mxu0 %vm42_vm0, %v17_v8  ;;  %328 = vmatprep.mubr.msk.f32.mxu1 %vm42_vm0, %v25_v9  ;;  %v29_v17 = vld [vmem:[%s475_s0 + $0x70] sm:$0xff]  ;;  %v22_v18 = vld [vmem:[%s475_s0 + $0x38] sm:$0xff]  ;;  %v268_v20 = vld [vmem:[%s477_s2] ss:$0 sm:$0xff] }
   0xd   :  { %v30_v19 = vld [vmem:[%s475_s0 + $0x78] sm:$0xff]  ;;  %s370_s0 = smov [#allocation2]  }
   0xe   :  { %s257_s2 = sshll.u32 %s370_s0, 4  ;;  %s258_s2 = int_to_ptr.vmem [resolvable:$true] %s257_s2 }
   0xf   :  { %317 = vmatmul.mubr.msk.f32.gmra.mxu0 %vm42_vm0, %v18_v10  ;;  %329 = vmatmul.mubr.msk.f32.gmra.mxu1 %vm42_vm0, %v26_v11  ;;  %s348_s1 = scalar_lea.vmem %s258_s2, 2048  ;;  %p353_p1 = scmp.lt.s32.totalorder %s258_s2, %s258_s2 }
  0x10   :  { %319 = vmatprep.mubr.msk.f32.mxu0 %vm42_vm0, %v19_v12  ;;  %331 = vmatprep.mubr.msk.f32.mxu1 %vm42_vm0, %v27_v13  ;;  %p349_p0 = scmp.ne.s32.totalorder %s258_s2, %s348_s1  ;;  %p354_p2 = scmp.lt.s32.totalorder %s348_s1, %s348_s1 }
  0x12   :  { %p355_p3 = por %p354_p2, %p353_p1 }
  0x13   :  { %320 = vmatmul.mubr.msk.f32.gmra.mxu0 %vm42_vm0, %v20_v14  ;;  %332 = vmatmul.mubr.msk.f32.gmra.mxu1 %vm42_vm0, %v28_v15 }
  0x14   :  { %322 = vmatprep.mubr.msk.f32.mxu0 %vm42_vm0, %v21_v16  ;;  %334 = vmatprep.mubr.msk.f32.mxu1 %vm42_vm0, %v29_v17  ;;  %p356_p4 = pnand %p355_p3, %p349_p0 }
  0x17   :  { %323 = vmatmul.mubr.msk.f32.gmra.mxu0 %vm42_vm0, %v22_v18  ;;  %335 = vmatmul.mubr.msk.f32.gmra.mxu1 %vm42_vm0, %v30_v19 }
  0xcb   :  { %v315_v21 = vpop.f32.mrf.mxu0  ;;  %v327_v22 = vpop.f32.mrf.mxu1 }
  0xcc   :  { %v163_v23 = vadd.f32 %v315_v21, %v268_v20  ;;  %v203_v24 = vadd.f32 %v327_v22, %v268_v20 }
  0xcd   :  { %v157_v25 = vpop.f32.mrf.mxu0  ;;  %v197_v26 = vpop.f32.mrf.mxu1 }
  0xce   :  { %237 = vst [vmem:[#allocation2 + $0x8] sm:$0xff] %v163_v23  ;;  %245 = vst [vmem:[#allocation2 + $0x48] sm:$0xff] %v203_v24  ;;  %v158_v27 = vadd.f32 %v268_v20, %v157_v25  ;;  %v198_v28 = vadd.f32 %v268_v20, %v197_v26 }
  0xcf   :  { %v318_v29 = vpop.f32.mrf.mxu0  ;;  %v330_v30 = vpop.f32.mrf.mxu1 }
  0xd0   :  { %236 = vst [vmem:[#allocation2] sm:$0xff] %v158_v27  ;;  %244 = vst [vmem:[#allocation2 + $0x40] sm:$0xff] %v198_v28  ;;  %v173_v31 = vadd.f32 %v318_v29, %v268_v20  ;;  %v213_v32 = vadd.f32 %v330_v30, %v268_v20 }
  0xd1   :  { %v167_v33 = vpop.f32.mrf.mxu0  ;;  %v207_v34 = vpop.f32.mrf.mxu1 }
  0xd2   :  { %239 = vst [vmem:[#allocation2 + $0x18] sm:$0xff] %v173_v31  ;;  %247 = vst [vmem:[#allocation2 + $0x58] sm:$0xff] %v213_v32  ;;  %v168_v35 = vadd.f32 %v268_v20, %v167_v33  ;;  %v208_v36 = vadd.f32 %v268_v20, %v207_v34 }
  0xd3   :  { %v321_v37 = vpop.f32.mrf.mxu0  ;;  %v333_v38 = vpop.f32.mrf.mxu1 }
  0xd4   :  { %238 = vst [vmem:[#allocation2 + $0x10] sm:$0xff] %v168_v35  ;;  %246 = vst [vmem:[#allocation2 + $0x50] sm:$0xff] %v208_v36  ;;  %v183_v39 = vadd.f32 %v321_v37, %v268_v20  ;;  %v223_v40 = vadd.f32 %v333_v38, %v268_v20 }
  0xd5   :  { %v177_v41 = vpop.f32.mrf.mxu0  ;;  %v217_v42 = vpop.f32.mrf.mxu1 }
  0xd6   :  { %241 = vst [vmem:[#allocation2 + $0x28] sm:$0xff] %v183_v39  ;;  %249 = vst [vmem:[#allocation2 + $0x68] sm:$0xff] %v223_v40  ;;  %v178_v43 = vadd.f32 %v268_v20, %v177_v41  ;;  %v218_v44 = vadd.f32 %v268_v20, %v217_v42 }
  0xd7   :  { %v324_v45 = vpop.f32.mrf.mxu0  ;;  %v336_v46 = vpop.f32.mrf.mxu1 }
  0xd8   :  { %240 = vst [vmem:[#allocation2 + $0x20] sm:$0xff] %v178_v43  ;;  %248 = vst [vmem:[#allocation2 + $0x60] sm:$0xff] %v218_v44  ;;  %v193_v47 = vadd.f32 %v324_v45, %v268_v20  ;;  %v233_v48 = vadd.f32 %v336_v46, %v268_v20 }
  0xd9   :  { %v187_v49 = vpop.f32.mrf.mxu0  ;;  %v227_v50 = vpop.f32.mrf.mxu1 }
  0xda   :  { %243 = vst [vmem:[#allocation2 + $0x38] sm:$0xff] %v193_v47  ;;  %251 = vst [vmem:[#allocation2 + $0x78] sm:$0xff] %v233_v48  ;;  %v188_v51 = vadd.f32 %v268_v20, %v187_v49  ;;  %v228_v52 = vadd.f32 %v268_v20, %v227_v50 }
  0xdc   :  { %242 = vst [vmem:[#allocation2 + $0x30] sm:$0xff] %v188_v51  ;;  %250 = vst [vmem:[#allocation2 + $0x70] sm:$0xff] %v228_v52 }
  0xdd   :  { %359 = shalt.err (!%p356_p4)
}
  0xde   :  { %s371_s26 = smov 128   ;;  %s372_s27 = smov 8  }
  0xdf   :  { %263 = dma.vmem_to_hbm [thread:$0]  %s258_s2, 2048, %s478_s3, [#allocation3], %s371_s26, %s371_s26, %s372_s27  }
  0xe0   :  { %368 = dma.done.wait [#allocation3], 2048  }
  0xe1   :  { %369 = vsyncadd [#allocation3], 4294965248 }
  0xe2   :  { %267 = vsyncpa [#allocation3], 1 }

</bundles_post_ra>
